<compile_context>
chip_gen: v7x
topology: tpu7x:2x2x1
jax: 0.10.0
libtpu: 0.0.40
codegen_flags: <defaults>
</compile_context>

<pallas_src>
import math

import jax
import jax.numpy as jnp
from jax import lax
from jax.experimental import pallas as pl
from jax.experimental.pallas import tpu as pltpu


# ---------------------------------------------------------------------------
# Kernel bodies
# ---------------------------------------------------------------------------

def _dot_xt(x, w):
    # x: (TM, TK), w: (TN, TK) -> (TM, TN).  Contract the lane dims of both, i.e.
    # x @ w.T without materializing a transpose of the weight tile (MXU-native NT dot).
    return lax.dot_general(
        x, w,
        dimension_numbers=(((1,), (1,)), ((), ())),
        preferred_element_type=jnp.float32)


def _mean_kernel(x_ref, mu_w_ref, mu_b_ref, o_ref, acc_ref):
    """sample=False: out = x @ mu_w.T + mu_b  (no sigma / eps HBM traffic, no exp)."""
    k = pl.program_id(2)

    @pl.when(k == 0)
    def _():
        acc_ref[...] = jnp.zeros_like(acc_ref)

    acc_ref[...] += _dot_xt(x_ref[...], mu_w_ref[...])

    @pl.when(k == pl.num_programs(2) - 1)
    def _():
        o_ref[...] = (acc_ref[...] + mu_b_ref[...]).astype(o_ref.dtype)


def _sample_kernel(x_ref, mu_w_ref, sig_w_ref, eps_w_ref,
                   mu_b_ref, sig_b_ref, eps_b_ref, o_ref, acc_ref):
    """sample=True: weight = mu_w + exp(sig_w) * eps_w, bias likewise (epilogue only)."""
    k = pl.program_id(2)

    @pl.when(k == 0)
    def _():
        acc_ref[...] = jnp.zeros_like(acc_ref)

    w = mu_w_ref[...] + jnp.exp(sig_w_ref[...]) * eps_w_ref[...]
    acc_ref[...] += _dot_xt(x_ref[...], w)

    @pl.when(k == pl.num_programs(2) - 1)
    def _():
        # Bias reparameterization only once per output tile.
        b = mu_b_ref[...] + jnp.exp(sig_b_ref[...]) * eps_b_ref[...]
        o_ref[...] = (acc_ref[...] + b).astype(o_ref.dtype)


# ---------------------------------------------------------------------------
# Wrapper
# ---------------------------------------------------------------------------

def _round_up(n, m):
    return ((n + m - 1) // m) * m


def _pad2(a, rows, cols):
    pr, pc = rows - a.shape[0], cols - a.shape[1]
    return jnp.pad(a, ((0, pr), (0, pc))) if (pr or pc) else a


def _sublane_multiple(dtype):
    # Min sublane count for a packed tile: 8 (f32), 16 (bf16), 32 (int8/fp8).
    return max(8, 32 // jnp.dtype(dtype).itemsize)


# vmem_limit raised so the larger double-buffered weight tiles fit v5e's 16 MiB default
# scoped VMEM; actual footprint at default tiles is ~16 MiB, well under v7x's 64 MiB.
_COMPILER_PARAMS = pltpu.CompilerParams(
    dimension_semantics=("parallel", "parallel", "arbitrary"),
    vmem_limit_bytes=64 << 20)


def rand_linear(x, mu_w, sig_w=None, mu_b=None, sig_b=None, *,
                sample=True, key=None, eps_w=None, eps_b=None,
                tm=256, tn=512, tk=1024):
    """Pallas-TPU implementation of RandLinear.forward.

    x:     (..., in_features)
    mu_w:  (out_features, in_features)     sig_w: same shape
    mu_b:  (out_features,) or None         sig_b: same shape or None

    sample=False            -> x @ mu_w.T + mu_b
    sample=True, eps given  -> reparameterized weights with the supplied eps (bit-exact)
    sample=True, key given  -> eps_w / eps_b drawn in the wrapper with jax.random.normal
                               (same distribution as torch.randn_like).
    """
    assert tn % 128 == 0 and tk % 128 == 0, "tile dims must be multiples of 128"
    out_f, in_f = mu_w.shape

    has_bias = mu_b is not None
    if not has_bias:
        # bias=False: feed zero bias streams (mu_b=0, sig_b=0, eps_b=0 -> bias term = 0).
        mu_b = jnp.zeros((out_f,), dtype=mu_w.dtype)
        sig_b = jnp.zeros((out_f,), dtype=mu_w.dtype)

    if sample and eps_w is None:
        assert key is not None, "sample=True needs either eps_w/eps_b or a PRNG key"
        kw, kb = jax.random.split(key)
        eps_w = jax.random.normal(kw, mu_w.shape, dtype=mu_w.dtype)
        eps_b = jax.random.normal(kb, (out_f,), dtype=mu_w.dtype)
    if sample and not has_bias:
        eps_b = jnp.zeros((out_f,), dtype=mu_w.dtype)

    lead = x.shape[:-1]
    x2 = x.reshape(-1, in_f)
    B = x2.shape[0]

    # Lane/sublane aligned, zero-padded problem.  Zero-padded K columns contribute
    # nothing (x is zero there); padded N rows / M rows are sliced off at the end.
    sub = _sublane_multiple(x.dtype)
    assert tm % sub == 0
    TM = min(tm, _round_up(B, sub))
    TN = min(tn, _round_up(out_f, 128))
    TK = min(tk, _round_up(in_f, 128))
    B_p = _round_up(B, TM)
    out_p = _round_up(out_f, TN)
    in_p = _round_up(in_f, TK)
    grid = (B_p // TM, out_p // TN, in_p // TK)

    x_p = _pad2(x2, B_p, in_p)
    mu_w_p = _pad2(mu_w, out_p, in_p)
    mu_b_p = _pad2(mu_b.reshape(1, out_f), 1, out_p)

    out_shape = jax.ShapeDtypeStruct((B_p, out_p), x.dtype)
    scratch = [pltpu.VMEM((TM, TN), jnp.float32)]

    x_spec = pl.BlockSpec((TM, TK), lambda m, j, k: (m, k))
    w_spec = pl.BlockSpec((TN, TK), lambda m, j, k: (j, k))
    b_spec = pl.BlockSpec((1, TN), lambda m, j, k: (0, j))
    o_spec = pl.BlockSpec((TM, TN), lambda m, j, k: (m, j))

    itemsize = jnp.dtype(x.dtype).itemsize
    flops = 2 * B_p * out_p * in_p

    if not sample:
        cost = pl.CostEstimate(
            flops=flops, transcendentals=0,
            bytes_accessed=(B_p * in_p + out_p * in_p + out_p + B_p * out_p) * itemsize)
        out_full = pl.pallas_call(
            _mean_kernel,
            out_shape=out_shape,
            grid_spec=pltpu.PrefetchScalarGridSpec(
                num_scalar_prefetch=0, grid=grid,
                in_specs=[x_spec, w_spec, b_spec],
                out_specs=o_spec,
                scratch_shapes=scratch),
            compiler_params=_COMPILER_PARAMS,
            cost_estimate=cost,
        )(x_p, mu_w_p, mu_b_p)
    else:
        sig_w_p = _pad2(sig_w, out_p, in_p)
        eps_w_p = _pad2(eps_w, out_p, in_p)
        sig_b_p = _pad2(sig_b.reshape(1, out_f), 1, out_p)
        eps_b_p = _pad2(eps_b.reshape(1, out_f), 1, out_p)
        cost = pl.CostEstimate(
            flops=flops, transcendentals=out_p * in_p + out_p,
            bytes_accessed=(B_p * in_p + 3 * out_p * in_p + 3 * out_p
                            + B_p * out_p) * itemsize)
        out_full = pl.pallas_call(
            _sample_kernel,
            out_shape=out_shape,
            grid_spec=pltpu.PrefetchScalarGridSpec(
                num_scalar_prefetch=0, grid=grid,
                in_specs=[x_spec, w_spec, w_spec, w_spec,
                          b_spec, b_spec, b_spec],
                out_specs=o_spec,
                scratch_shapes=scratch),
            compiler_params=_COMPILER_PARAMS,
            cost_estimate=cost,
        )(x_p, mu_w_p, sig_w_p, eps_w_p, mu_b_p, sig_b_p, eps_b_p)

    return out_full[:B, :out_f].reshape(*lead, out_f)


def init_rand_linear_params(key, in_features, out_features, init_s=0.0001,
                            dtype=jnp.float32):
    """Deterministic equivalent of RandLinear.reset_parameters()."""
    stdv = 1.0 / math.sqrt(in_features)
    k_w, k_b = jax.random.split(key)
    mu_w = jax.random.uniform(k_w, (out_features, in_features),
                              minval=-stdv, maxval=stdv, dtype=dtype)
    sig_w = jnp.full((out_features, in_features), init_s, dtype=dtype)
    mu_b = jax.random.uniform(k_b, (out_features,),
                              minval=-stdv, maxval=stdv, dtype=dtype)
    sig_b = jnp.full((out_features,), init_s, dtype=dtype)
    return mu_w, sig_w, mu_b, sig_b


if __name__ == "__main__":
    key = jax.random.PRNGKey(0)
    k_param, k_x, k_eps = jax.random.split(key, 3)

    # Small but tiling-exercising shapes: 128x128 feature tiles -> grid (1, 3, 3),
    # non-multiple-of-128 feature dims and a non-multiple-of-8 batch to test padding.
    B, in_features, out_features = 4, 384, 320
    tm, tn, tk = 256, 128, 128

    mu_w, sig_w, mu_b, sig_b = init_rand_linear_params(
        k_param, in_features, out_features, init_s=0.0001)
    x = jax.random.normal(k_x, (B, in_features), dtype=jnp.float32)

    # --- 1) sample=False: deterministic mean weights, exact check -----------------
    out_mean = jax.block_until_ready(
        rand_linear(x, mu_w, sig_w, mu_b, sig_b, sample=False, tm=tm, tn=tn, tk=tk))
    ref_mean = jnp.matmul(x, mu_w.T, precision=lax.Precision.HIGHEST) + mu_b
    assert out_mean.shape == (B, out_features)
    assert jnp.allclose(out_mean, ref_mean, atol=2e-2, rtol=2e-2), "sample=False mismatch"

    # --- 2) sample=True with externally supplied eps: exact reparam check ---------
    kw, kb = jax.random.split(k_eps)
    eps_w = jax.random.normal(kw, mu_w.shape, dtype=mu_w.dtype)
    eps_b = jax.random.normal(kb, mu_b.shape, dtype=mu_b.dtype)
    out_eps = jax.block_until_ready(
        rand_linear(x, mu_w, sig_w, mu_b, sig_b, sample=True,
                    eps_w=eps_w, eps_b=eps_b, tm=tm, tn=tn, tk=tk))
    w_ref = mu_w + jnp.exp(sig_w) * eps_w
    b_ref = mu_b + jnp.exp(sig_b) * eps_b
    ref_eps = jnp.matmul(x, w_ref.T, precision=lax.Precision.HIGHEST) + b_ref
    assert jnp.allclose(out_eps, ref_eps, atol=2e-2, rtol=2e-2), "sample=True (eps) mismatch"

    # --- 3) sample=True with a key: wrapper draws eps ~ N(0,1), check against the
    #        identical eps regenerated here ------------------------------------------
    out_key = jax.block_until_ready(
        rand_linear(x, mu_w, sig_w, mu_b, sig_b, sample=True, key=k_eps,
                    tm=tm, tn=tn, tk=tk))
    assert out_key.shape == (B, out_features)
    assert jnp.allclose(out_key, ref_eps, atol=2e-2, rtol=2e-2), "sample=True (key) mismatch"

    # --- 4) bias=False variant (zero bias streams) -----------------------------------
    out_nobias = jax.block_until_ready(
        rand_linear(x, mu_w, sig_w, None, None, sample=True,
                    eps_w=eps_w, tm=tm, tn=tn, tk=tk))
    ref_nobias = jnp.matmul(x, w_ref.T, precision=lax.Precision.HIGHEST)
    assert jnp.allclose(out_nobias, ref_nobias, atol=2e-2, rtol=2e-2), "bias=False mismatch"

    print("KERNEL_OK")
</pallas_src>

<mosaic_0001>
module attributes {stable_mosaic.version = 11 : i64} {
  func.func @_mean_kernel(%arg0: i32, %arg1: i32, %arg2: i32, %arg3: memref<8x128xf32, #tpu.memory_space<vmem>>, %arg4: memref<128x128xf32, #tpu.memory_space<vmem>>, %arg5: memref<1x128xf32, #tpu.memory_space<vmem>>, %arg6: memref<8x128xf32, #tpu.memory_space<vmem>>, %arg7: memref<8x128xf32, #tpu.memory_space<vmem>>) attributes {dimension_semantics = [#tpu.dimension_semantics<parallel>, #tpu.dimension_semantics<parallel>, #tpu.dimension_semantics<arbitrary>], iteration_bounds = array<i64: 1, 3, 3>, scalar_prefetch = 0 : i64, scratch_operands = 1 : i64, tpu.core_type = #tpu.core_type<tc>, window_params = [{transform_indices = @transform_0, window_bounds = array<i64: 8, 128>}, {transform_indices = @transform_1, window_bounds = array<i64: 128, 128>}, {transform_indices = @transform_2, window_bounds = array<i64: 1, 128>}, {transform_indices = @transform_3, window_bounds = array<i64: 8, 128>}]} {
    %c0_i32 = arith.constant 0 : i32
    %0 = arith.cmpi eq, %arg2, %c0_i32 : i32
    %1 = arith.extui %0 : i1 to i32
    %c0_i32_0 = arith.constant 0 : i32
    %2 = arith.cmpi ne, %1, %c0_i32_0 : i32
    scf.if %2 {
      %cst_9 = arith.constant 0.000000e+00 : f32
      %12 = vector.broadcast %cst_9 : f32 to vector<8x128xf32>
      %c0_10 = arith.constant 0 : index
      %c0_11 = arith.constant 0 : index
      %13 = vector.load %arg7[%c0_10, %c0_11] : memref<8x128xf32, #tpu.memory_space<vmem>>, vector<8x128xf32>
      tpu.vector_store %arg7[%c0_10, %c0_11], %12 {strides = array<i32>} : memref<8x128xf32, #tpu.memory_space<vmem>>, vector<8x128xf32>,
    } else {
    }
    %c0 = arith.constant 0 : index
    %c0_1 = arith.constant 0 : index
    %3 = vector.load %arg7[%c0, %c0_1] : memref<8x128xf32, #tpu.memory_space<vmem>>, vector<8x128xf32>
    %c0_2 = arith.constant 0 : index
    %c0_3 = arith.constant 0 : index
    %4 = vector.load %arg3[%c0_2, %c0_3] : memref<8x128xf32, #tpu.memory_space<vmem>>, vector<8x128xf32>
    %c0_4 = arith.constant 0 : index
    %c0_5 = arith.constant 0 : index
    %5 = vector.load %arg4[%c0_4, %c0_5] : memref<128x128xf32, #tpu.memory_space<vmem>>, vector<128x128xf32>
    %cst = arith.constant dense<0.000000e+00> : vector<8x128xf32>
    %6 = tpu.matmul %4, %5, %cst {dimension_numbers = #tpu.dot_dimension_numbers<[1], [1], [0], [0], [0, 0, 1, 0], [], []>} : vector<8x128xf32>, vector<128x128xf32>, vector<8x128xf32> -> vector<8x128xf32>
    %7 = arith.addf %3, %6 : vector<8x128xf32>
    %c0_6 = arith.constant 0 : index
    %c0_7 = arith.constant 0 : index
    %8 = vector.load %arg7[%c0_6, %c0_7] : memref<8x128xf32, #tpu.memory_space<vmem>>, vector<8x128xf32>
    tpu.vector_store %arg7[%c0_6, %c0_7], %7 {strides = array<i32>} : memref<8x128xf32, #tpu.memory_space<vmem>>, vector<8x128xf32>,
    %c2_i32 = arith.constant 2 : i32
    %9 = arith.cmpi eq, %arg2, %c2_i32 : i32
    %10 = arith.extui %9 : i1 to i32
    %c0_i32_8 = arith.constant 0 : i32
    %11 = arith.cmpi ne, %10, %c0_i32_8 : i32
    scf.if %11 {
      %c0_9 = arith.constant 0 : index
      %c0_10 = arith.constant 0 : index
      %12 = vector.load %arg7[%c0_9, %c0_10] : memref<8x128xf32, #tpu.memory_space<vmem>>, vector<8x128xf32>
      %c0_11 = arith.constant 0 : index
      %c0_12 = arith.constant 0 : index
      %13 = vector.load %arg5[%c0_11, %c0_12] : memref<1x128xf32, #tpu.memory_space<vmem>>, vector<1x128xf32>
      %14 = vector.broadcast %13 : vector<1x128xf32> to vector<8x128xf32>
      %15 = arith.addf %12, %14 : vector<8x128xf32>
      %c0_13 = arith.constant 0 : index
      %c0_14 = arith.constant 0 : index
      %16 = vector.load %arg6[%c0_13, %c0_14] : memref<8x128xf32, #tpu.memory_space<vmem>>, vector<8x128xf32>
      tpu.vector_store %arg6[%c0_13, %c0_14], %15 {strides = array<i32>} : memref<8x128xf32, #tpu.memory_space<vmem>>, vector<8x128xf32>,
    } else {
    }
    return
  }
  func.func @transform_0(%arg0: i32, %arg1: i32, %arg2: i32) -> (i32, i32) {
    %c0_i32 = arith.constant 0 : i32
    return %arg0, %arg2 : i32, i32
  }
  func.func @transform_1(%arg0: i32, %arg1: i32, %arg2: i32) -> (i32, i32) {
    %c0_i32 = arith.constant 0 : i32
    return %arg1, %arg2 : i32, i32
  }
  func.func @transform_2(%arg0: i32, %arg1: i32, %arg2: i32) -> (i32, i32) {
    %c0_i32 = arith.constant 0 : i32
    %c0_i32_0 = arith.constant 0 : i32
    return %c0_i32, %arg1 : i32, i32
  }
  func.func @transform_3(%arg0: i32, %arg1: i32, %arg2: i32) -> (i32, i32) {
    %c0_i32 = arith.constant 0 : i32
    return %arg0, %arg1 : i32, i32
  }
}

</mosaic_0001>

<bundles_post_ra>
// kernel: tpu_custom_call.1
= control target key start
LH: loop header
LB: loop body
LE: loop exit
PB: predicated region body
PF: predicated region fallthrough
CT: control target
= control target key end

     0   :  { %s1490_s0 = inlined_call_operand.hbm [shape: f32[8,384], index: 0, kind: input, shape index: {}]   ;;  %s1491_s1 = inlined_call_operand.hbm [shape: f32[384,384], index: 1, kind: input, shape index: {}]   ;;  %s1492_s2 = inlined_call_operand.hbm [shape: f32[1,384], index: 2, kind: input, shape index: {}]   ;;  %s1493_s3 = inlined_call_operand.hbm [shape: f32[8,384], index: 3, kind: output, shape index: {}]  }
   0x1   :  { %1508 = sst [smem:[#allocation20_spill]] %s1490_s0 }
   0x2   :  { %1509 = sst [smem:[#allocation21_spill]] %s1491_s1 }
   0x3   :  { %1510 = sst [smem:[#allocation22_spill]] %s1493_s3 }
   0x4   :  { %8 = vsyncpa [#allocation4], 0 }
   0x5   :  { %10 = vsyncpa [#allocation4 + $0x1], 0 }
   0x6   :  { %11 = vsyncpa [#allocation7], 0 }
   0x7   :  { %13 = vsyncpa [#allocation7 + $0x1], 0 }
   0x8   :  { %14 = vsyncpa [#allocation5], 0 }
   0x9   :  { %16 = vsyncpa [#allocation5 + $0x1], 0  ;;  %s1061_s12 = smov 0   ;;  %s1063_s13 = smov 0  }
   0xa   :  { %s1065_s14 = smov 0   ;;  %s1067_s15 = smov 0  }
   0xb   :  { %s1069_s16 = smov 0   ;;  %s1071_s17 = smov 0  }
   0xc   :  { %s1073_s18 = smov 0   ;;  %s1075_s19 = smov 0  }
   0xd   :  { %s1077_s20 = smov 0   ;;  %s1079_s21 = smov 0  }
   0xe   :  { %s1081_s22 = smov 0   ;;  %s1083_s23 = smov 0  }
   0xf   :  { %s1085_s24 = smov 0   ;;  %s1087_s25 = smov 0  }
  0x10 LB: > { %1511 = sst [smem:[#allocation14_spill]] %s1008_s20  ;;  %s1494_s26 = sadd.s32 1, %s1020_s23  ;;  %s1028_s25 = sphi %s1087_s25, %s22_s25   ;;  %s1024_s24 = sphi %s1085_s24, %s1553_s24   ;;  %s1020_s23 = sphi %s1083_s23, %s1552_s23   ;;  %s1016_s22 = sphi %s1081_s22, %s1551_s22   ;;  %s1012_s21 = sphi %s1079_s21, %s1550_s21   ;;  %s1008_s20 = sphi %s1077_s20, %s1562_s20   ;;  %s1004_s19 = sphi %s1075_s19, %s1561_s19   ;;  %s1000_s18 = sphi %s1073_s18, %s1560_s18   ;;  %s996_s17 = sphi %s1071_s17, %s1559_s17   ;;  %s992_s16 = sphi %s1069_s16, %s1558_s16   ;;  %s988_s15 = sphi %s1067_s15, %s1557_s15   ;;  %s984_s14 = sphi %s1065_s14, %s1556_s14   ;;  %s980_s13 = sphi %s1063_s13, %s1555_s13   ;;  %s976_s12 = sphi %s1061_s12, %s1554_s12  }
  0x11   : > { %1512 = sst [smem:[#allocation15_spill]] %s1020_s23  ;;  %p1497_p0 = scmp.eq.s32.totalorder %s1028_s25, 0 }
  0x12   : > { %1513 = sst [smem:[#allocation16_spill]] %s1024_s24  ;;  %p1135_p1 = scmp.ge.s32.totalorder %s1494_s26, 3 }
  0x13   : > { %p85_p2 = scmp.ne.s32.totalorder %s996_s17, %s992_s16  ;;  %p1496_p4 = scmp.lt.s32.totalorder %s1028_s25, 9 }
  0x14   : > { %s189_s29 = sand.u32 1, %s1028_s25   ;;  %s191_s30 = sand.u32 1, %s996_s17  }
  0x15   : > { %p87_p5 = por %p85_p2, %p1497_p0  ;;  %s548_s4 = sshll.u32 %s191_s30, 7 }
  0x16   : > { %s640_s5 = smul.u32 48, %s1024_s24  ;;  %s193_s8 = scalar_lea.vmem [#allocation6], %s548_s4 }
  0x17   : > { %p1152_p6 = pnand %p1496_p4, %p87_p5  ;;  %s202_s9 = sshll.u32 %s193_s8, 4  ;;  %s1157_s9 = int_to_ptr.vmem [resolvable:$true] %s202_s9 }
  0x18   : > { %s199_s7 = sadd.s32 %s1020_s23, %s640_s5  ;;  %s1516_s1 = sld [smem:[#allocation21_spill]] }
  0x19   : > { %s551_s10 = sshll.u32 %s199_s7, 7  ;;  %s1165_s30 = scalar_lea.sflag [#allocation7], %s189_s29 }
  0x1a   : > { %p786_p9 = pneg %p1152_p6 }
  0x1e   : > { %s1162_s26 = scalar_lea.hbm %s1516_s1, %s551_s10  ;;  %s789_s28 = scalar_lea.hbm %s1516_s1, 18432 }
  0x1f   : > { %s784_s3 = scalar_lea.hbm %s1162_s26, 2048  ;;  %p790_p12 = scmp.lt.u32.totalorder %s1162_s26, %s1516_s1 }
  0x20   : > { %p785_p8 = scmp.ne.s32.totalorder %s1162_s26, %s784_s3  ;;  %p791_p13 = scmp.lt.u32.totalorder %s789_s28, %s784_s3 }
  0x21   : > { %p793_p5 = scmp.lt.u32.totalorder %s784_s3, %s1162_s26 }
  0x22   : > { %p787_p10 = pnand %p786_p9, %p785_p8  ;;  %p792_p2 = por %p791_p13, %p790_p12 }
  0x24   : > { %p788_p11 = pneg %p787_p10  ;;  %p794_p4 = por %p793_p5, %p792_p2 }
  0x26   : > { %p795_p3 = pnand %p794_p4, %p788_p11 }
  0x28   : > { %798 = shalt.err (!%p795_p3)
}
  0x29   : > { %s799_s29 = scalar_lea.vmem %s1157_s9, 2048  ;;  %s1030_s10 = smov [#allocation6]  }
  0x2a   : > { %p800_p8 = scmp.ne.s32.totalorder %s1157_s9, %s799_s29  ;;  %s804_s11 = sshll.u32 %s1030_s10, 4  ;;  %s805_s11 = int_to_ptr.vmem [resolvable:$false] %s804_s11 }
  0x2b   : > { %s806_s4 = scalar_lea.vmem %s805_s11, 4096  ;;  %p807_p7 = scmp.lt.s32.totalorder %s1157_s9, %s805_s11 }
  0x2c   : > { %p802_p10 = pnand %p800_p8, %p786_p9  ;;  %p808_p12 = scmp.lt.s32.totalorder %s806_s4, %s799_s29 }
  0x2e   : > { %p803_p0 = pneg %p802_p10  ;;  %p809_p13 = por %p808_p12, %p807_p7 }
  0x30   : > { %p810_p2 = pnand %p809_p13, %p803_p0 }
  0x32   : > { %813 = shalt.err (!%p810_p2)
}
  0x33   : > { %s1031_s3 = smov 384   ;;  %s1032_s5 = smov 128  }
  0x34   : > { %s1033_s28 = smov 8   ;;  %p227_p0 = scmp.lt.s32.totalorder %s1028_s25, 10 }
  0x35   : > { %655 = dma.hbm_to_vmem [thread:$0]  (!%p1152_p6), %s1162_s26, 2048, %s1157_s9, %s1165_s30, %s1031_s3, %s1032_s5, %s1033_s28  }
  0x36   : > { %p1517_p3 = scmp.ge.s32.totalorder %s1028_s25, 1  ;;  %s1201_s8 = sadd.s32 4294967295, %s1028_s25  }
  0x37   : > { %s37_s29 = sadd.s32 1, %s1024_s24  ;;  %s1519_s10 = sadd.s32 1, %s1020_s23 }
  0x38   : > { %p1196_p4 = pnand %p1517_p3, %p227_p0  ;;  %s1564_s10 = smov (%p1135_p1, %s1519_s10), 0 }
  0x39   : > { %1520 = sst [smem:[#allocation17_spill]] %s1564_s10  ;;  %s1566_s29 = smov (!%p1135_p1, %s37_s29), %s1024_s24 }
  0x3a   : > { %s1518_s7 = scalar_select %p1196_p4, 1, 0 }
  0x3b   : > { %s46_s26 = ssub.s32 %s1020_s23, %s1564_s10  ;;  %s50_s6 = sadd.s32 1, %s1008_s20 }
  0x3c   : > { %p39_p6 = scmp.ge.s32.totalorder %s1566_s29, 3  ;;  %p48_p7 = scmp.eq.s32.totalorder %s46_s26, 0 }
  0x3d   : > { %p57_p9 = scmp.ne.s32.totalorder %s1008_s20, %s1004_s19  ;;  %p63_p11 = scmp.ne.s32.totalorder %s1004_s19, %s1000_s18 }
  0x3e   : > { %s1568_s29 = smov (%p39_p6, %s1566_s29), 0  ;;  %p1523_p5 = scmp.eq.s32.totalorder %s1028_s25, 0 }
  0x3f   : > { %1521 = sst [smem:[#allocation18_spill]] %s1568_s29  ;;  %p1501_p8 = scmp.eq.s32.totalorder %s1201_s8, 0 }
  0x40   : > { %s1223_s9 = scalar_select %p48_p7, %s1008_s20, %s50_s6  }
  0x41   : > { %p1227_p1 = por %p1523_p5, %p57_p9  ;;  %s1234_s11 = ssub.s32 %s1024_s24, %s1568_s29 }
  0x42   : > { %1522 = sst [smem:[#allocation19_spill]] %s1223_s9  ;;  %s169_s4 = sand.u32 1, %s1008_s20  }
  0x43   : > { %p1239_p10 = por %p1501_p8, %p63_p11  ;;  %s75_s3 = sor.u32 %s1234_s11, %s46_s26 }
  0x44   : > { %p76_p12 = scmp.eq.s32.totalorder %s75_s3, 0  ;;  %p1526_p13 = scmp.ne.s32.totalorder %s992_s16, %s988_s15 }
  0x45   : > { %s1525_s18 = scalar_select %p1239_p10, 1, 0 }
  0x46   : > { %p1249_p2 = por %p1526_p13, %p1501_p8  ;;  %s546_s28 = sshll.u32 %s169_s4, 3 }
  0x47   : > { %s1528_s6 = sadd.s32 1, %s996_s17  ;;  %s547_s29 = sshll.u32 %s1020_s23, 7 }
  0x48   : > { %s1527_s5 = scalar_select %p1249_p2, 1, 0 }
  0x49   : > { %s1256_s1 = scalar_select %p76_p12, %s996_s17, %s1528_s6  }
  0x4a   : > { %s1529_s0 = sld [smem:[#allocation20_spill]]  ;;  %s173_s26 = scalar_lea.vmem [#allocation3], %s546_s28 }
  0x4b   : > { %s182_s15 = sshll.u32 %s173_s26, 4  ;;  %p1530_p0 = scmp.lt.s32.totalorder %s1028_s25, 9  ;;  %s1264_s15 = int_to_ptr.vmem [resolvable:$true] %s182_s15 }
  0x4c   : > { %s170_s6 = scalar_lea.sflag [#allocation4], %s169_s4 }
  0x4d   : > { %p1270_p3 = pnand %p1530_p0, %p1227_p1 }
  0x4f   : > { %p816_p7 = pneg %p1270_p3 }
  0x50   : > { %s1262_s20 = scalar_lea.hbm %s1529_s0, %s547_s29  ;;  %s819_s27 = scalar_lea.hbm %s1529_s0, 384 }
  0x51   : > { %s814_s10 = scalar_lea.hbm %s1262_s20, 128  ;;  %p820_p5 = scmp.lt.u32.totalorder %s1262_s20, %s1529_s0 }
  0x52   : > { %p815_p6 = scmp.ne.s32.totalorder %s1262_s20, %s814_s10  ;;  %p821_p1 = scmp.lt.u32.totalorder %s819_s27, %s814_s10 }
  0x53   : > { %p823_p13 = scmp.lt.u32.totalorder %s814_s10, %s1262_s20 }
  0x54   : > { %p817_p9 = pnand %p816_p7, %p815_p6  ;;  %p822_p12 = por %p821_p1, %p820_p5 }
  0x56   : > { %p818_p11 = pneg %p817_p9  ;;  %p824_p0 = por %p823_p13, %p822_p12 }
  0x58   : > { %p825_p8 = pnand %p824_p0, %p818_p11 }
  0x5a   : > { %828 = shalt.err (!%p825_p8)
}
  0x5b   : > { %s829_s4 = scalar_lea.vmem %s1264_s15, 128  ;;  %s1034_s29 = smov [#allocation3]  }
  0x5c   : > { %p830_p6 = scmp.ne.s32.totalorder %s1264_s15, %s829_s4  ;;  %s834_s9 = sshll.u32 %s1034_s29, 4  ;;  %s835_s9 = int_to_ptr.vmem [resolvable:$false] %s834_s9 }
  0x5d   : > { %s836_s28 = scalar_lea.vmem %s835_s9, 256  ;;  %p837_p10 = scmp.lt.s32.totalorder %s1264_s15, %s835_s9 }
  0x5e   : > { %p832_p9 = pnand %p830_p6, %p816_p7  ;;  %p838_p5 = scmp.lt.s32.totalorder %s836_s28, %s829_s4 }
  0x60   : > { %p833_p2 = pneg %p832_p9  ;;  %p839_p1 = por %p838_p5, %p837_p10 }
  0x62   : > { %p840_p12 = pnand %p839_p1, %p833_p2 }
  0x64   : > { %843 = shalt.err (!%p840_p12)
}
  0x65   : > { %652 = dma.hbm_to_vmem [thread:$0]  (!%p1270_p3), %s1262_s20, 128, %s1264_s15, %s170_s6  }
  0x66   : > { %s543_s10 = sadd.s32 4294967294, %s1028_s25   ;;  %p102_p8 = scmp.eq.s32.totalorder %s1234_s11, 0 }
  0x67   : > { %s104_s3 = sadd.s32 1, %s984_s14  ;;  %p111_p10 = scmp.ne.s32.totalorder %s984_s14, %s980_s13 }
  0x68   : > { %p117_p2 = scmp.ne.s32.totalorder %s980_s13, %s976_s12  ;;  %p1532_p7 = scmp.eq.s32.totalorder %s1028_s25, 0 }
  0x69   : > { %s1307_s27 = scalar_select %p102_p8, %s984_s14, %s104_s3  }
  0x6a   : > { %p113_p11 = por %p111_p10, %p1532_p7  ;;  %p1533_p13 = scmp.eq.s32.totalorder %s1201_s8, 0 }
  0x6b   : > { %p143_p6 = scmp.eq.s32.totalorder %s1201_s8, 8  ;;  %p149_p9 = scmp.eq.s32.totalorder %s543_s10, 8 }
  0x6c   : > { %p1313_p0 = por %p117_p2, %p1533_p13  ;;  %s214_s4 = sand.u32 1, %s984_s14  }
  0x6d   : > { %s552_s29 = sshll.u32 %s1024_s24, 4  ;;  %p1320_p3 = por %p143_p6, %p111_p10 }
  0x6e   : > { %s1534_s26 = scalar_select %p1313_p0, 1, 0 }
  0x6f   : > { %s1535_s20 = scalar_select %p1320_p3, 1, 0 }
  0x70   : > { %p1324_p5 = por %p149_p9, %p117_p2  ;;  %s1331_s9 = scalar_lea.hbm %s1492_s2, %s552_s29 }
  0x71   : > { %s215_s28 = scalar_lea.vmem [#allocation8], %s214_s4  ;;  %p1537_p1 = scmp.lt.s32.totalorder %s1028_s25, 9 }
  0x72   : > { %s1536_s11 = scalar_select %p1324_p5, 1, 0 }
  0x73   : > { %s222_s10 = sshll.u32 %s215_s28, 4  ;;  %p1335_p12 = pnand %p1537_p1, %p113_p11  ;;  %s223_s10 = int_to_ptr.vmem [resolvable:$true] %s222_s10 }
  0x74   : > { %s844_s0 = scalar_lea.hbm %s1331_s9, 16  ;;  %s849_s4 = scalar_lea.hbm %s1492_s2, 48 }
  0x75   : > { %p845_p8 = scmp.ne.s32.totalorder %s1331_s9, %s844_s0  ;;  %p846_p10 = pneg %p1335_p12 }
  0x76   : > { %p850_p11 = scmp.lt.u32.totalorder %s1331_s9, %s1492_s2  ;;  %p851_p13 = scmp.lt.u32.totalorder %s849_s4, %s844_s0 }
  0x77   : > { %p847_p2 = pnand %p846_p10, %p845_p8  ;;  %p853_p9 = scmp.lt.u32.totalorder %s844_s0, %s1331_s9 }
  0x78   : > { %p852_p6 = por %p851_p13, %p850_p11 }
  0x79   : > { %p848_p7 = pneg %p847_p2 }
  0x7a   : > { %p854_p1 = por %p853_p9, %p852_p6 }
  0x7c   : > { %p855_p5 = pnand %p854_p1, %p848_p7 }
  0x7e   : > { %858 = shalt.err (!%p855_p5)
}
  0x7f   : > { %s859_s24 = scalar_lea.vmem %s223_s10, 16  ;;  %s1035_s23 = smov [#allocation8]  }
  0x80   : > { %p860_p3 = scmp.ne.s32.totalorder %s223_s10, %s859_s24  ;;  %s864_s29 = sshll.u32 %s1035_s23, 4  ;;  %s865_s29 = int_to_ptr.vmem [resolvable:$false] %s864_s29 }
  0x81   : > { %s866_s15 = scalar_lea.vmem %s865_s29, 32  ;;  %p867_p0 = scmp.lt.s32.totalorder %s223_s10, %s865_s29 }
  0x82   : > { %p862_p8 = pnand %p860_p3, %p846_p10  ;;  %p868_p4 = scmp.lt.s32.totalorder %s866_s15, %s859_s24 }
  0x84   : > { %p863_p2 = pneg %p862_p8  ;;  %p869_p11 = por %p868_p4, %p867_p0 }
  0x86   : > { %p870_p13 = pnand %p869_p11, %p863_p2 }
  0x88   : > { %873 = shalt.err (!%p870_p13)
}
  0x89   : > { %658 = dma.hbm_to_vmem [thread:$0]  (!%p1335_p12), %s1331_s9, 16, %s223_s10, %s1165_s30  }
  0x8a   : > { %p1539_p5 = scmp.ne.s32.totalorder %s1518_s7, 0 }
  0x8b   : > { %s233_s0 = sand.u32 (!%p1539_p5), 1, %s1004_s19   ;;  %p1540_p3 = scmp.ne.s32.totalorder (!%p1539_p5), %s1525_s18, 0 }
  0x8c   : > { %231 = sbr.rel (%p1539_p5) target bundleno = 483 (0x1e3), region = 32  ;;  %s1364_s4 = sshll.u32 (!%p1539_p5), %s233_s0, 3 }
  0x8d   : > { %s234_s23 = scalar_lea.sflag (!%p1539_p5), [#allocation4], %s233_s0  ;;  %s237_s6 = scalar_lea.vmem (!%p1539_p5), [#allocation3], %s1364_s4 }
  0x93   : > { %959 = dma.done.wait (%p1540_p3), %s234_s23, 128  }
  0x94   : > { %961 = vsyncadd (%p1540_p3), %s234_s23, 4294967168  ;;  %s242_s24 = sand.u32 1, %s1201_s8   ;;  %s244_s30 = sand.u32 1, %s992_s16  }
  0x95   : > { %s555_s7 = sshll.u32 %s244_s30, 7  ;;  %s243_s9 = scalar_lea.sflag [#allocation7], %s242_s24 }
  0x96   : > { %s1373_s10 = scalar_lea.vmem [#allocation6], %s555_s7  ;;  %p1541_p4 = scmp.ne.s32.totalorder %s1527_s5, 0 }
  0x98   : > { %963 = dma.done.wait (%p1541_p4), %s243_s9, 2048  }
  0x99   : > { %965 = vsyncadd (%p1541_p4), %s243_s9, 4294965248  ;;  %s1380_s3 = sand.u32 1, %s980_s13   ;;  %p1542_p0 = scmp.ne.s32.totalorder %s1534_s26, 0 }
  0x9a   : > { %s254_s18 = scalar_lea.vmem [#allocation8], %s1380_s3 }
  0x9b   : > { %967 = dma.done.wait (%p1542_p0), %s243_s9, 16  }
  0x9c   : > { %969 = vsyncadd (%p1542_p0), %s243_s9, 4294967280  ;;  %s556_s8 = sshll.u32 %s1380_s3, 3  ;;  %p557_p12 = scmp.ne.s32.totalorder %s1012_s21, 0 }
  0x9d   : > { %s1388_s28 = scalar_lea.vmem [#allocation9], %s556_s8  ;;  %v1036_v0 = vmov (!%p557_p12), 0.0  }
  0x9e   : > { %290 = sbr.rel (%p557_p12) target bundleno = 165 (0xa5), region = 48  ;;  %291 = vst [vmem:[#allocation2] sm:$0xff] (!%p557_p12), %v1036_v0 }
  0xa5 PF: > { %v294_v1 = vld [vmem:[%s1373_s10] sm:$0xff]  ;;  %v295_v2 = vld [vmem:[%s1373_s10 + $0x8] sm:$0xff]  ;;  %v1037_v3 = vmov 0.0|0.0   ;;  %vm1038_vm0 = vmmov 0   ;;  %v1039_v5 = vmov 0.0   ;;  %v296_v6 = vld [vmem:[%s1373_s10 + $0x10] sm:$0xff] }
  0xa6   : > { %616 = vmatprep.subr.bf16.mxu0 %v1037_v3  ;;  %v617_v4 = vpack.c.bf16 %v295_v2, %v294_v1  ;;  %613 = vmatprep.mubr.msk.f32.mxu0 %vm1038_vm0, %v1039_v5  ;;  %v297_v7 = vld [vmem:[%s1373_s10 + $0x18] sm:$0xff]  ;;  %v298_v9 = vld [vmem:[%s1373_s10 + $0x20] sm:$0xff]  ;;  %v299_v10 = vld [vmem:[%s1373_s10 + $0x28] sm:$0xff]  ;;  %p558_p10 = scmp.ne.s32.totalorder %s1012_s21, 2 }
  0xa7   : > { %v620_v8 = vpack.c.bf16 %v297_v7, %v296_v6  ;;  %v623_v11 = vpack.c.bf16 %v299_v10, %v298_v9  ;;  %v300_v12 = vld [vmem:[%s1373_s10 + $0x30] sm:$0xff]  ;;  %v301_v13 = vld [vmem:[%s1373_s10 + $0x38] sm:$0xff]  ;;  %v302_v15 = vld [vmem:[%s1373_s10 + $0x40] sm:$0xff] }
  0xa8   : > { %618 = vmatpush3.bf16.xpose.msra.mxu0 %v617_v4  ;;  %v626_v14 = vpack.c.bf16 %v301_v13, %v300_v12  ;;  %v303_v16 = vld [vmem:[%s1373_s10 + $0x48] sm:$0xff]  ;;  %v304_v18 = vld [vmem:[%s1373_s10 + $0x50] sm:$0xff]  ;;  %v305_v19 = vld [vmem:[%s1373_s10 + $0x58] sm:$0xff] }
  0xa9   : > { %619 = vmatprep.subr.bf16.mxu0 %v1037_v3  ;;  %v629_v17 = vpack.c.bf16 %v303_v16, %v302_v15  ;;  %v632_v20 = vpack.c.bf16 %v305_v19, %v304_v18  ;;  %v306_v21 = vld [vmem:[%s1373_s10 + $0x60] sm:$0xff]  ;;  %v307_v22 = vld [vmem:[%s1373_s10 + $0x68] sm:$0xff]  ;;  %v308_v24 = vld [vmem:[%s1373_s10 + $0x70] sm:$0xff] }
  0xaa   : > { %v635_v23 = vpack.c.bf16 %v307_v22, %v306_v21  ;;  %v309_v25 = vld [vmem:[%s1373_s10 + $0x78] sm:$0xff]  ;;  %v292_v28 = vld [vmem:[#allocation2] sm:$0xff] }
  0xab   : > { %v638_v26 = vpack.c.bf16 %v309_v25, %v308_v24  ;;  %v293_v27 = vld [vmem:[%s237_s6] sm:$0xff]  ;;  %v559_v33 = vld [vmem:[%s254_s18] ss:$0 sm:$0xff] (!%p558_p10) }
  0xb0   : > { %621 = vmatpush3.bf16.xpose.msra.mxu0 %v620_v8 }
  0xb1   : > { %622 = vmatprep.subr.bf16.mxu0 %v1037_v3 }
  0xb8   : > { %624 = vmatpush3.bf16.xpose.msra.mxu0 %v623_v11 }
  0xb9   : > { %625 = vmatprep.subr.bf16.mxu0 %v1037_v3 }
  0xc0   : > { %627 = vmatpush3.bf16.xpose.msra.mxu0 %v626_v14 }
  0xc1   : > { %628 = vmatprep.subr.bf16.mxu0 %v1037_v3 }
  0xc8   : > { %630 = vmatpush3.bf16.xpose.msra.mxu0 %v629_v17 }
  0xc9   : > { %631 = vmatprep.subr.bf16.mxu0 %v1037_v3 }
  0xd0   : > { %633 = vmatpush3.bf16.xpose.msra.mxu0 %v632_v20 }
  0xd1   : > { %634 = vmatprep.subr.bf16.mxu0 %v1037_v3 }
  0xd8   : > { %636 = vmatpush3.bf16.xpose.msra.mxu0 %v635_v23 }
  0xd9   : > { %637 = vmatprep.subr.bf16.mxu0 %v1037_v3 }
  0xe0   : > { %639 = vmatpush3.bf16.xpose.msra.mxu0 %v638_v26 }
  0xe7   : > { %614 = vmatmul.mubr.f32.vlgmr.msra.gmra.mrb[0].mxu0 %v293_v27 }
 0x1b7   : > { %385 = sbr.rel (%p558_p10) target bundleno = 456 (0x1c8), region = 52 }
 0x1ba   : > { %v376_v29 = vpop.f32.mrb[0].mxu0 }
 0x1bb   : > { %v380_v30 = vadd.f32 %v376_v29, %v292_v28  ;;  %v615_v31 = vpop.f32.mrb[1].mxu0 }
 0x1bd   : > { %381 = vst [vmem:[#allocation2] sm:$0xff] %v380_v30 }
 0x1c4   : > { %v386_v32 = vld [vmem:[#allocation2] sm:$0xff] }
 0x1c5   : > { %v394_v34 = vadd.f32 %v559_v33, %v386_v32 }
 0x1c7   : > { %395 = vst [vmem:[%s1388_s28] sm:$0xff] %v394_v34 }
 0x1c8 PF: > { %s561_s5 = sshll.u32 %s1016_s22, 7  ;;  %s1543_s15 = sld [smem:[#allocation22_spill]] }
 0x1c9   : > { %s412_s21 = sshll.u32 %s1388_s28, 4  ;;  %s397_s23 = scalar_lea.sflag [#allocation5], %s1380_s3  ;;  %s413_s21 = int_to_ptr.vmem [resolvable:$true] %s412_s21 }
 0x1ca   : > { %s874_s6 = scalar_lea.vmem %s413_s21, 128  ;;  %p1545_p6 = scmp.ne.s32.totalorder %s1535_s20, 0 }
 0x1cb   : > { %p875_p7 = scmp.ne.s32.totalorder %s413_s21, %s874_s6  ;;  %s1040_s24 = smov [#allocation9]  }
 0x1cc   : > { %s878_s30 = sshll.u32 %s1040_s24, 4  ;;  %s879_s30 = int_to_ptr.vmem [resolvable:$false] %s878_s30 }
 0x1cd   : > { %p876_p9 = pnand %p875_p7, %p1545_p6  ;;  %s880_s7 = scalar_lea.vmem %s879_s30, 256 }
 0x1ce   : > { %s1544_s0 = smov %s1543_s15  ;;  %s1417_s4 = scalar_lea.hbm %s1543_s15, %s561_s5 }
 0x1cf   : > { %p877_p1 = pneg %p876_p9  ;;  %p881_p8 = scmp.lt.s32.totalorder %s413_s21, %s879_s30 }
 0x1d0   : > { %p882_p2 = scmp.lt.s32.totalorder %s880_s7, %s874_s6 }
 0x1d2   : > { %p883_p11 = por %p882_p2, %p881_p8 }
 0x1d4   : > { %p884_p13 = pnand %p883_p11, %p877_p1 }
 0x1d6   : > { %887 = shalt.err (!%p884_p13)
}
 0x1d7   : > { %s888_s22 = scalar_lea.hbm %s1417_s4, 128  ;;  %s892_s3 = scalar_lea.hbm %s1544_s0, 384 }
 0x1d8   : > { %p889_p5 = scmp.ne.s32.totalorder %s1417_s4, %s888_s22  ;;  %p893_p0 = scmp.lt.u32.totalorder %s1417_s4, %s1544_s0 }
 0x1d9   : > { %p894_p12 = scmp.lt.u32.totalorder %s892_s3, %s888_s22  ;;  %p896_p7 = scmp.lt.u32.totalorder %s888_s22, %s1417_s4 }
 0x1da   : > { %p890_p3 = pnand %p889_p5, %p1545_p6 }
 0x1db   : > { %p895_p10 = por %p894_p12, %p893_p0 }
 0x1dc   : > { %p891_p4 = pneg %p890_p3 }
 0x1dd   : > { %p897_p9 = por %p896_p7, %p895_p10 }
 0x1df   : > { %p898_p1 = pnand %p897_p9, %p891_p4 }
 0x1e1   : > { %901 = shalt.err (!%p898_p1)
}
 0x1e2   : > { %647 = dma.vmem_to_hbm [thread:$0]  (%p1545_p6), %s413_s21, 128, %s1417_s4, %s397_s23  }
 0x1e3 PF: > { %p664_p8 = scmp.ge.s32.totalorder %s1028_s25, 2  ;;  %s424_s28 = sand.u32 1, %s976_s12  }
 0x1e4   : > { %p1546_p2 = scmp.ne.s32.totalorder %s1536_s11, 0  ;;  %s425_s5 = scalar_lea.sflag [#allocation5], %s424_s28 }
 0x1e6   : > { %p660_p11 = pnand %p664_p8, %p1546_p2 }
 0x1e8   : > { %971 = dma.done.wait (!%p660_p11), %s425_s5, 128  }
 0x1e9   : > { %973 = vsyncadd (!%p660_p11), %s425_s5, 4294967168  ;;  %s22_s25 = sadd.s32 1, %s1028_s25   ;;  %s1548_s20 = sld [smem:[#allocation14_spill]] }
 0x1ea   : > { %p1443_p13 = scmp.ge.s32.totalorder %s22_s25, 11   ;;  %s1549_s29 = sld [smem:[#allocation19_spill]] }
 0x1eb   : > { %s1550_s21 = sld [smem:[#allocation15_spill]]  ;;  %s1551_s22 = sld [smem:[#allocation16_spill]] }
 0x1ec   : > { %s1552_s23 = sld [smem:[#allocation17_spill]]  ;;  %s1553_s24 = sld [smem:[#allocation18_spill]] }
 0x1ed   : > { %s1554_s12 = smov %s980_s13  ;;  %s1555_s13 = smov %s984_s14 }
 0x1ee   : > { %s1556_s14 = smov %s1307_s27  ;;  %s1557_s15 = smov %s992_s16 }
 0x1ef   : > { %s1558_s16 = smov %s996_s17  ;;  %s1559_s17 = smov %s1256_s1 }
 0x1f0   : > { %s1560_s18 = smov %s1004_s19  ;;  %s1561_s19 = smov %s1548_s20 }
 0x1f1   : > { %s1562_s20 = smov %s1549_s29  ;;  %21 = sbr.rel (!%p1443_p13) target bundleno = 16 (0x10), region = 109 }
 0x1f8   :  { %430 = vsyncpa [#allocation4], 1 }
 0x1f9   :  { %432 = vsyncpa [#allocation4 + $0x1], 1 }
 0x1fa   :  { %433 = vsyncpa [#allocation7], 1 }
 0x1fb   :  { %435 = vsyncpa [#allocation7 + $0x1], 1 }
 0x1fc   :  { %436 = vsyncpa [#allocation5], 1 }
 0x1fd   :  { %438 = vsyncpa [#allocation5 + $0x1], 1 }

</bundles_post_ra>
